<compile_context>
chip_gen: v7x
topology: tpu7x:2x2x1
jax: 0.10.0
libtpu: 0.0.40
codegen_flags: <defaults>
</compile_context>

<pallas_src>
import functools

import jax
import jax.numpy as jnp
from jax.experimental import pallas as pl
from jax.experimental.pallas import tpu as pltpu

# PyTorch nn.LSTM gate order in weight_ih / bias: [input, forget, cell(g), output]
_GATE_I, _GATE_F, _GATE_G, _GATE_O = 0, 1, 2, 3


def _round_up(x, m):
    return (x + m - 1) // m * m


def _device_kind():
    try:
        return jax.devices()[0].device_kind.lower()
    except Exception:
        return ""


def _gate_dtype():
    # bf16 VPU/EUP only exists on v6e / v7x; keep the gate math in f32 elsewhere.
    kind = _device_kind()
    if "v6" in kind or "v7" in kind or "tpu7" in kind:
        return jnp.bfloat16
    return jnp.float32


# -----------------------------------------------------------------------------
# One-time parameter preparation (hoisted out of the forward pass).
# -----------------------------------------------------------------------------
def prepare_params(params, num_continuous, *, fold_vocab_threshold=512):
    """Repack PyTorch-layout parameters into the kernel layout.

    - drops the dead forget gate (c0 == 0) and w_hh (h0 == 0, single step)
    - folds b_ih + b_hh into a single bias per layer
    - packs [i|g|o] into one 128-lane group when 3*H <= 128, else three Hp groups
    - pads hidden/gate/output dims to 128 lanes (lane-aligned slices, dense stores)
    - small vocabularies: folds each embedding table into the layer-0 weights and
      stacks everything into ONE (Kp, Gp) contraction matrix (one-hot gather)
    - large vocabularies: keeps tables for an XLA gather outside the kernel
    - casts all matmul operands to bf16 (f32 accumulation inside the kernel)
    """
    lstm_layers = params["lstm_layers"]
    H = lstm_layers[0]["w_hh"].shape[1]
    Hp = max(_round_up(H, 128), 128)
    small_pack = 3 * H <= 128              # [i|g|o] fit in one 128-lane group
    Gp = 128 if small_pack else 3 * Hp
    O = params["linear_w"].shape[0]
    Op = max(_round_up(O, 128), 128)
    tables = params["embedding_tables"]
    E = tables[0].shape[1] if tables else 0
    vocabs = [int(t.shape[0]) for t in tables]
    fold = bool(tables) and (sum(vocabs) <= fold_vocab_threshold)

    def pack_gates(m):                      # (rows, 4H) -> (rows, Gp); drops forget gate
        groups = [m[:, g * H:(g + 1) * H] for g in (_GATE_I, _GATE_G, _GATE_O)]
        if small_pack:
            w = jnp.concatenate(groups, axis=1)              # (rows, 3H)
            return jnp.pad(w, ((0, 0), (0, Gp - 3 * H)))
        groups = [jnp.pad(g, ((0, 0), (0, Hp - H))) for g in groups]
        return jnp.concatenate(groups, axis=1)               # (rows, 3*Hp)

    def pack_bias(b):                       # (4H,) -> (1, Gp)
        return pack_gates(b.reshape(1, -1))

    packed = {"H": H, "Hp": Hp, "Gp": Gp, "O": O, "Op": Op, "E": E,
              "small_pack": small_pack, "num_continuous": num_continuous,
              "num_layers": len(lstm_layers), "fold": fold}

    # ---- layer 0 -------------------------------------------------------------
    l0 = lstm_layers[0]
    w0_full = pack_gates(l0["w_ih"].T.astype(jnp.float32))       # (C+E, Gp) f32
    b0 = pack_bias((l0["b_ih"] + l0["b_hh"]).astype(jnp.float32))
    C = num_continuous
    w0_cont, w0_emb = w0_full[:C], w0_full[C:]                   # (C, Gp), (E, Gp)

    if fold:
        # Continuous block padded to a 128-lane-aligned width so the in-kernel concat
        # with the one-hot block sits exactly on a vreg boundary (no unaligned concat).
        Cp = max(_round_up(max(C, 1), 128), 128)
        Kcat = sum(vocabs)
        Kcat_p = max(_round_up(Kcat, 128), 128)
        rows = [jnp.pad(w0_cont, ((0, Cp - C), (0, 0)))]
        offsets, off = [], 0
        for tbl in tables:
            offsets.append(off)
            rows.append(tbl.astype(jnp.float32) @ w0_emb)        # fold: (V, Gp)
            off += tbl.shape[0]
        rows.append(jnp.zeros((Kcat_p - Kcat, Gp), jnp.float32))
        packed.update(
            w0=jnp.concatenate(rows, axis=0).astype(jnp.bfloat16),   # (Cp+Kcat_p, Gp)
            b0=b0, Cp=Cp, Kp=Cp + Kcat_p, cat_offsets=tuple(offsets))
    else:
        # Large vocabularies: keep the tables out of VMEM; gather happens in the
        # wrapper (XLA) and the kernel consumes a dense [x_cont | emb_sum] operand.
        Kd = C + E
        Kp = max(_round_up(Kd, 128), 128)
        packed.update(
            w0=jnp.pad(w0_full, ((0, Kp - Kd), (0, 0))).astype(jnp.bfloat16),
            b0=b0, Cp=Kp, Kp=Kp, cat_offsets=(),
            gather_tables=[t.astype(jnp.float32) for t in tables])

    # ---- layers 1..L-1 --------------------------------------------------------
    layers = []
    for layer in lstm_layers[1:]:
        w = pack_gates(layer["w_ih"].T.astype(jnp.float32))      # (H, Gp)
        w = jnp.pad(w, ((0, Hp - H), (0, 0))).astype(jnp.bfloat16)  # zero rows >= H
        b = pack_bias((layer["b_ih"] + layer["b_hh"]).astype(jnp.float32))
        layers.append((w, b))
    packed["layers"] = layers

    # ---- linear head (lane-dense Op = multiple of 128) ------------------------
    wl = params["linear_w"].T.astype(jnp.float32)                # (H, O)
    packed["w_lin"] = jnp.pad(wl, ((0, Hp - H), (0, Op - O))).astype(jnp.bfloat16)
    packed["b_lin"] = jnp.pad(params["linear_b"].astype(jnp.float32),
                              (0, Op - O)).reshape(1, -1)        # (1, Op)
    return packed


# -----------------------------------------------------------------------------
# Pallas kernel: fused one-hot embedding + stacked single-step LSTM + linear head.
# -----------------------------------------------------------------------------
def _lstm_head_kernel(*refs, num_layers, num_cat, cat_offsets, H, Hp, Gp,
                      small_pack, gate_dtype):
    """refs (all VMEM, in order):
       x_dense (TB, Cp|Kp) bf16   -- [x_cont | 0-pad] (fold) or [x_cont | emb_sum | pad]
       x_cat   (TB, num_cat) i32  -- only present when num_cat > 0 (fold mode)
       w0 (Kp, Gp) bf16, b0 (1, Gp) f32
       (w_l (Hp, Gp) bf16, b_l (1, Gp) f32) for layers 1..L-1
       w_lin (Hp, Op) bf16, b_lin (1, Op) f32
       out (TB, Op) f32
    """
    it = iter(refs)
    x_dense_ref = next(it)
    x_cat_ref = next(it) if num_cat > 0 else None
    w0_ref, b0_ref = next(it), next(it)
    layer_refs = [(next(it), next(it)) for _ in range(num_layers - 1)]
    w_lin_ref, b_lin_ref, out_ref = next(it), next(it), next(it)

    tb = x_dense_ref.shape[0]
    x_dense = x_dense_ref[...]                                   # bf16

    if num_cat > 0:
        # Multi-feature one-hot block: one compare per feature (disjoint row ranges
        # in w0), OR'd together, then a single lane-dense matmul for layer 0.
        kcat = w0_ref.shape[0] - x_dense.shape[1]                # one-hot block width
        lane = jax.lax.broadcasted_iota(jnp.int32, (tb, kcat), 1)
        hit = lane == (x_cat_ref[:, 0:1] + cat_offsets[0])
        for j in range(1, num_cat):
            hit = jnp.logical_or(hit, lane == (x_cat_ref[:, j:j + 1] + cat_offsets[j]))
        onehot = jnp.where(hit, 1.0, 0.0).astype(jnp.bfloat16)
        # Both parts are multiples of 128 lanes -> concat boundary is vreg-aligned.
        lhs = jnp.concatenate([x_dense, onehot], axis=1)         # (TB, Kp)
    else:
        lhs = x_dense                                            # already Kp wide

    gates = jnp.dot(lhs, w0_ref[...], preferred_element_type=jnp.float32) + b0_ref[...]

    def sigmoid_via_tanh(x):             # 1 EUP push instead of exp + reciprocal
        return 0.5 * jnp.tanh(0.5 * x) + 0.5

    f32_gates = jnp.dtype(gate_dtype) == jnp.dtype(jnp.float32)

    def cell(g_all):                     # g_all: (TB, Gp) f32 matmul accumulation
        # Gate order [i, g, o]; forget gate dropped (c0 == 0), w_hh dropped (h0 == 0).
        # c = i*g, h = o*tanh(c).  Junk in padded/rolled lanes is killed by the zero
        # weight rows (>= H) of the next matmul.
        if small_pack:
            if f32_gates:
                # One sigmoid + one tanh pass over the packed [i|g|o] block, then
                # XLU rolls align g and o with i (rolls are ~free: XLU slot is idle).
                s = sigmoid_via_tanh(g_all)
                t = jnp.tanh(g_all)
                g_t = pltpu.roll(t, Gp - H, axis=1)              # g gate -> lanes [0:H]
                o_s = pltpu.roll(s, Gp - 2 * H, axis=1)          # o gate -> lanes [0:H]
                return o_s * jnp.tanh(s * g_t)
            # bf16 gates (v6e/v7x): roll the f32 pre-activations (32-bit lane rolls),
            # then run the nonlinearities in bf16 (bf16 EUP/VPU ~2x throughput).
            g_g = pltpu.roll(g_all, Gp - H, axis=1).astype(gate_dtype)
            g_o = pltpu.roll(g_all, Gp - 2 * H, axis=1).astype(gate_dtype)
            g_i = g_all.astype(gate_dtype)
            return sigmoid_via_tanh(g_o) * jnp.tanh(sigmoid_via_tanh(g_i) * jnp.tanh(g_g))
        g_all = g_all.astype(gate_dtype)
        i_s = sigmoid_via_tanh(g_all[:, 0 * Hp:1 * Hp])
        g_t = jnp.tanh(g_all[:, 1 * Hp:2 * Hp])
        o_s = sigmoid_via_tanh(g_all[:, 2 * Hp:3 * Hp])
        return o_s * jnp.tanh(i_s * g_t)

    h = cell(gates)
    for w_ref, b_ref in layer_refs:
        g = jnp.dot(h.astype(jnp.bfloat16), w_ref[...],
                    preferred_element_type=jnp.float32) + b_ref[...]
        h = cell(g)

    # Dropout is eval-mode identity.  Lane-dense (TB, Op) store; real O sliced outside.
    out_ref[...] = (jnp.dot(h.astype(jnp.bfloat16), w_lin_ref[...],
                            preferred_element_type=jnp.float32) + b_lin_ref[...])


def lstm_base_forward(x_continuous, x_categorical, packed, *, batch_tile=512):
    """Forward pass using pre-packed params (see prepare_params)."""
    B = x_continuous.shape[0]
    C = packed["num_continuous"]
    H, Hp, Gp = packed["H"], packed["Hp"], packed["Gp"]
    O, Op, Kp, Cp = packed["O"], packed["Op"], packed["Kp"], packed["Cp"]
    num_layers = packed["num_layers"]

    if packed["fold"]:
        num_cat = x_categorical.shape[1]
        x_dense = jnp.pad(x_continuous.astype(jnp.float32),
                          ((0, 0), (0, Cp - C))).astype(jnp.bfloat16)
    else:
        # Large-vocab guard: gather + sum embeddings with XLA outside the kernel.
        num_cat = 0
        emb = None
        for j, tbl in enumerate(packed["gather_tables"]):
            e = jnp.take(tbl, x_categorical[:, j], axis=0)
            emb = e if emb is None else emb + e
        x_dense = jnp.concatenate([x_continuous.astype(jnp.float32), emb], axis=-1)
        x_dense = jnp.pad(x_dense, ((0, 0), (0, Kp - x_dense.shape[1]))).astype(jnp.bfloat16)

    # Batch tile: as large as reasonable (per-grid-step overhead ~0.35us), a multiple
    # of 8 (or == B), and sized so the grid has >= 2 steps whenever B allows, so a
    # v7x megacore actually shards the "parallel" batch axis across both TensorCores.
    if B <= 8:
        TB = B
    else:
        TB = min(batch_tile, max(8, _round_up(pl.cdiv(B, 2), 8)))
    grid = (pl.cdiv(B, TB),)

    operands = [x_dense]
    in_specs = [pl.BlockSpec((TB, x_dense.shape[1]), lambda i: (i, 0))]
    if num_cat > 0:
        operands.append(x_categorical.astype(jnp.int32))
        in_specs.append(pl.BlockSpec((TB, num_cat), lambda i: (i, 0)))

    weight_ops = [packed["w0"], packed["b0"]]
    for w, b in packed["layers"]:
        weight_ops += [w, b]
    weight_ops += [packed["w_lin"], packed["b_lin"]]
    operands += weight_ops
    # Full-array blocks pinned to (0, 0): weights stay VMEM-resident across the grid.
    # TODO(synk): pipeline_mode=pl.Buffered(1) would halve their footprint on v7x.
    in_specs += [pl.BlockSpec(w.shape, lambda i: (0, 0)) for w in weight_ops]

    # Explicit scoped-VMEM budget: resident weights (x2 pipeline buffers), batch tiles
    # (x2), plus f32 gate/LHS temporaries, clamped to a per-generation ceiling.
    def nbytes(a):
        return a.size * jnp.dtype(a.dtype).itemsize
    est = (2 * sum(nbytes(w) for w in weight_ops)
           + 2 * (TB * x_dense.shape[1] * 2 + TB * max(num_cat, 1) * 4 + TB * Op * 4)
           + 8 * TB * max(Kp, Gp, Hp, Op) * 4)
    kind = _device_kind()
    cap = (48 << 20) if ("v7" in kind or "tpu7" in kind) else (100 << 20)
    vmem_limit = int(min(cap, max(32 << 20, est)))

    kernel = functools.partial(
        _lstm_head_kernel, num_layers=num_layers, num_cat=num_cat,
        cat_offsets=packed["cat_offsets"], H=H, Hp=Hp, Gp=Gp,
        small_pack=packed["small_pack"], gate_dtype=_gate_dtype())

    out = pl.pallas_call(
        kernel,
        out_shape=jax.ShapeDtypeStruct((B, Op), jnp.float32),
        grid=grid,
        in_specs=in_specs,
        out_specs=pl.BlockSpec((TB, Op), lambda i: (i, 0)),
        compiler_params=pltpu.CompilerParams(
            dimension_semantics=("parallel",),      # v7x: shard batch over both TCs
            vmem_limit_bytes=vmem_limit),
    )(*operands)
    return out[:, :O]


# -----------------------------------------------------------------------------
# Pure-JAX f32 reference (mirrors torch.nn.LSTM single step + Linear, eval dropout).
# -----------------------------------------------------------------------------
def _reference(x_continuous, x_categorical, params):
    emb_sum = None
    for j, table in enumerate(params["embedding_tables"]):
        e = jnp.take(table, x_categorical[:, j], axis=0)
        emb_sum = e if emb_sum is None else emb_sum + e
    h = jnp.concatenate([x_continuous, emb_sum], axis=-1)
    for layer in params["lstm_layers"]:
        H = layer["w_hh"].shape[1]
        h_prev = jnp.zeros((h.shape[0], H), jnp.float32)
        c_prev = jnp.zeros((h.shape[0], H), jnp.float32)
        gates = (h @ layer["w_ih"].T + layer["b_ih"]
                 + h_prev @ layer["w_hh"].T + layer["b_hh"])
        i_g = jax.nn.sigmoid(gates[:, 0 * H:1 * H])
        f_g = jax.nn.sigmoid(gates[:, 1 * H:2 * H])
        g_g = jnp.tanh(gates[:, 2 * H:3 * H])
        o_g = jax.nn.sigmoid(gates[:, 3 * H:4 * H])
        c = f_g * c_prev + i_g * g_g
        h = o_g * jnp.tanh(c)
    return h @ params["linear_w"].T + params["linear_b"]


# -----------------------------------------------------------------------------
if __name__ == "__main__":
    B = 8
    num_continuous = 4
    embedding_dim = 12
    hidden_size = 32
    num_layers = 2
    output_size = 4
    vocab_sizes = [10, 7]
    input_size = num_continuous + embedding_dim

    key = jax.random.PRNGKey(0)
    keys = iter(jax.random.split(key, 32))

    def init(shape, scale=0.1):
        return (scale * jax.random.normal(next(keys), shape)).astype(jnp.float32)

    params = {
        "embedding_tables": [init((v, embedding_dim)) for v in vocab_sizes],
        "lstm_layers": [],
        "linear_w": init((output_size, hidden_size)),
        "linear_b": init((output_size,)),
    }
    for layer in range(num_layers):
        in_l = input_size if layer == 0 else hidden_size
        params["lstm_layers"].append({
            "w_ih": init((4 * hidden_size, in_l)),
            "w_hh": init((4 * hidden_size, hidden_size)),
            "b_ih": init((4 * hidden_size,)),
            "b_hh": init((4 * hidden_size,)),
        })

    x_continuous = jax.random.normal(next(keys), (B, num_continuous), dtype=jnp.float32)
    x_categorical = jnp.stack(
        [jax.random.randint(next(keys), (B,), 0, v) for v in vocab_sizes], axis=-1
    ).astype(jnp.int32)

    # TODO(synk): process_embeddings() is not shown in the source module; assumed
    # "embed each categorical feature, sum, concat with continuous" (matches input_size).
    ref = _reference(x_continuous, x_categorical, params)

    # Path 1: small-vocab fold mode (one-hot embeddings fused into the layer-0 matmul).
    packed = prepare_params(params, num_continuous)              # one-time weight repack
    fwd = jax.jit(lambda xc, xq: lstm_base_forward(xc, xq, packed))
    out = jax.block_until_ready(fwd(x_continuous, x_categorical))
    assert out.shape == (B, output_size)
    # bf16 MXU inputs / optional bf16 gate math -> loosened tolerance vs f32 reference.
    assert jnp.allclose(out, ref, atol=3e-2, rtol=3e-2), (
        f"fold path max abs err {jnp.max(jnp.abs(out - ref))}")

    # Path 2: large-vocab guard (XLA gather outside the kernel), forced for coverage.
    packed_g = prepare_params(params, num_continuous, fold_vocab_threshold=0)
    fwd_g = jax.jit(lambda xc, xq: lstm_base_forward(xc, xq, packed_g))
    out_g = jax.block_until_ready(fwd_g(x_continuous, x_categorical))
    assert out_g.shape == (B, output_size)
    assert jnp.allclose(out_g, ref, atol=3e-2, rtol=3e-2), (
        f"gather path max abs err {jnp.max(jnp.abs(out_g - ref))}")

    print("KERNEL_OK")
</pallas_src>

<mosaic_0001>
module attributes {stable_mosaic.version = 11 : i64} {
  func.func @_lstm_head_kernel(%arg0: i32, %arg1: memref<8x128xbf16, #tpu.memory_space<vmem>>, %arg2: memref<8x2xi32, #tpu.memory_space<vmem>>, %arg3: memref<256x128xbf16, #tpu.memory_space<vmem>>, %arg4: memref<1x128xf32, #tpu.memory_space<vmem>>, %arg5: memref<128x128xbf16, #tpu.memory_space<vmem>>, %arg6: memref<1x128xf32, #tpu.memory_space<vmem>>, %arg7: memref<128x128xbf16, #tpu.memory_space<vmem>>, %arg8: memref<1x128xf32, #tpu.memory_space<vmem>>, %arg9: memref<8x128xf32, #tpu.memory_space<vmem>>) attributes {dimension_semantics = [#tpu.dimension_semantics<parallel>], iteration_bounds = array<i64: 1>, scalar_prefetch = 0 : i64, scratch_operands = 0 : i64, tpu.core_type = #tpu.core_type<tc>, window_params = [{transform_indices = @transform_0, window_bounds = array<i64: 8, 128>}, {transform_indices = @transform_1, window_bounds = array<i64: 8, 2>}, {pipeline_mode = #tpu.pipeline_mode<synchronous>, transform_indices = @transform_2, window_bounds = array<i64: 256, 128>}, {pipeline_mode = #tpu.pipeline_mode<synchronous>, transform_indices = @transform_3, window_bounds = array<i64: 1, 128>}, {pipeline_mode = #tpu.pipeline_mode<synchronous>, transform_indices = @transform_4, window_bounds = array<i64: 128, 128>}, {pipeline_mode = #tpu.pipeline_mode<synchronous>, transform_indices = @transform_5, window_bounds = array<i64: 1, 128>}, {pipeline_mode = #tpu.pipeline_mode<synchronous>, transform_indices = @transform_6, window_bounds = array<i64: 128, 128>}, {pipeline_mode = #tpu.pipeline_mode<synchronous>, transform_indices = @transform_7, window_bounds = array<i64: 1, 128>}, {transform_indices = @transform_8, window_bounds = array<i64: 8, 128>}]} {
    %c0 = arith.constant 0 : index
    %c0_0 = arith.constant 0 : index
    %0 = vector.load %arg1[%c0, %c0_0] : memref<8x128xbf16, #tpu.memory_space<vmem>>, vector<8x128xbf16>
    %1 = tpu.iota {dimensions = array<i32: 1>} : vector<8x128xi32>
    %c0_1 = arith.constant 0 : index
    %c0_2 = arith.constant 0 : index
    %2 = vector.load %arg2[%c0_1, %c0_2] : memref<8x2xi32, #tpu.memory_space<vmem>>, vector<8x1xi32>
    %c0_i32 = arith.constant 0 : i32
    %3 = vector.broadcast %c0_i32 : i32 to vector<8x1xi32>
    %4 = arith.addi %2, %3 : vector<8x1xi32>
    %5 = vector.broadcast %4 : vector<8x1xi32> to vector<8x128xi32>
    %6 = arith.cmpi eq, %1, %5 : vector<8x128xi32>
    %c0_3 = arith.constant 0 : index
    %c1 = arith.constant 1 : index
    %7 = vector.load %arg2[%c0_3, %c1] : memref<8x2xi32, #tpu.memory_space<vmem>>, vector<8x1xi32>
    %c10_i32 = arith.constant 10 : i32
    %8 = vector.broadcast %c10_i32 : i32 to vector<8x1xi32>
    %9 = arith.addi %7, %8 : vector<8x1xi32>
    %10 = vector.broadcast %9 : vector<8x1xi32> to vector<8x128xi32>
    %11 = arith.cmpi eq, %1, %10 : vector<8x128xi32>
    %12 = arith.ori %6, %11 : vector<8x128xi1>
    %cst = arith.constant 1.000000e+00 : f32
    %cst_4 = arith.constant 0.000000e+00 : f32
    %13 = vector.broadcast %cst : f32 to vector<8x128xf32>
    %14 = vector.broadcast %cst_4 : f32 to vector<8x128xf32>
    %15 = arith.select %12, %13, %14 : vector<8x128xi1>, vector<8x128xf32>
    %16 = arith.truncf %15 : vector<8x128xf32> to vector<8x128xbf16>
    %17 = tpu.concatenate %0, %16 in 1 : vector<8x128xbf16>, vector<8x128xbf16> -> vector<8x256xbf16>
    %c0_5 = arith.constant 0 : index
    %c0_6 = arith.constant 0 : index
    %18 = vector.load %arg3[%c0_5, %c0_6] : memref<256x128xbf16, #tpu.memory_space<vmem>>, vector<256x128xbf16>
    %cst_7 = arith.constant dense<0.000000e+00> : vector<8x128xf32>
    %19 = tpu.matmul %17, %18, %cst_7 {dimension_numbers = #tpu.dot_dimension_numbers<[1], [0], [0], [1], [0, 0, 1, 1], [], []>} : vector<8x256xbf16>, vector<256x128xbf16>, vector<8x128xf32> -> vector<8x128xf32>
    %c0_8 = arith.constant 0 : index
    %c0_9 = arith.constant 0 : index
    %20 = vector.load %arg4[%c0_8, %c0_9] : memref<1x128xf32, #tpu.memory_space<vmem>>, vector<1x128xf32>
    %21 = vector.broadcast %20 : vector<1x128xf32> to vector<8x128xf32>
    %22 = arith.addf %19, %21 : vector<8x128xf32>
    %cst_10 = arith.constant 5.000000e-01 : f32
    %23 = vector.broadcast %cst_10 : f32 to vector<8x128xf32>
    %24 = arith.mulf %23, %22 : vector<8x128xf32>
    %25 = math.tanh %24 : vector<8x128xf32>
    %cst_11 = arith.constant 5.000000e-01 : f32
    %26 = vector.broadcast %cst_11 : f32 to vector<8x128xf32>
    %27 = arith.mulf %26, %25 : vector<8x128xf32>
    %cst_12 = arith.constant 5.000000e-01 : f32
    %28 = vector.broadcast %cst_12 : f32 to vector<8x128xf32>
    %29 = arith.addf %27, %28 : vector<8x128xf32>
    %30 = math.tanh %22 : vector<8x128xf32>
    %c96_i32 = arith.constant 96 : i32
    %31 = tpu.dynamic_rotate %30 by %c96_i32 dim 1 : vector<8x128xf32>, i32 -> vector<8x128xf32>
    %c64_i32 = arith.constant 64 : i32
    %32 = tpu.dynamic_rotate %29 by %c64_i32 dim 1 : vector<8x128xf32>, i32 -> vector<8x128xf32>
    %33 = arith.mulf %29, %31 : vector<8x128xf32>
    %34 = math.tanh %33 : vector<8x128xf32>
    %35 = arith.mulf %32, %34 : vector<8x128xf32>
    %36 = arith.truncf %35 : vector<8x128xf32> to vector<8x128xbf16>
    %c0_13 = arith.constant 0 : index
    %c0_14 = arith.constant 0 : index
    %37 = vector.load %arg5[%c0_13, %c0_14] : memref<128x128xbf16, #tpu.memory_space<vmem>>, vector<128x128xbf16>
    %cst_15 = arith.constant dense<0.000000e+00> : vector<8x128xf32>
    %38 = tpu.matmul %36, %37, %cst_15 {dimension_numbers = #tpu.dot_dimension_numbers<[1], [0], [0], [1], [0, 0, 1, 1], [], []>} : vector<8x128xbf16>, vector<128x128xbf16>, vector<8x128xf32> -> vector<8x128xf32>
    %c0_16 = arith.constant 0 : index
    %c0_17 = arith.constant 0 : index
    %39 = vector.load %arg6[%c0_16, %c0_17] : memref<1x128xf32, #tpu.memory_space<vmem>>, vector<1x128xf32>
    %40 = vector.broadcast %39 : vector<1x128xf32> to vector<8x128xf32>
    %41 = arith.addf %38, %40 : vector<8x128xf32>
    %cst_18 = arith.constant 5.000000e-01 : f32
    %42 = vector.broadcast %cst_18 : f32 to vector<8x128xf32>
    %43 = arith.mulf %42, %41 : vector<8x128xf32>
    %44 = math.tanh %43 : vector<8x128xf32>
    %cst_19 = arith.constant 5.000000e-01 : f32
    %45 = vector.broadcast %cst_19 : f32 to vector<8x128xf32>
    %46 = arith.mulf %45, %44 : vector<8x128xf32>
    %cst_20 = arith.constant 5.000000e-01 : f32
    %47 = vector.broadcast %cst_20 : f32 to vector<8x128xf32>
    %48 = arith.addf %46, %47 : vector<8x128xf32>
    %49 = math.tanh %41 : vector<8x128xf32>
    %c96_i32_21 = arith.constant 96 : i32
    %50 = tpu.dynamic_rotate %49 by %c96_i32_21 dim 1 : vector<8x128xf32>, i32 -> vector<8x128xf32>
    %c64_i32_22 = arith.constant 64 : i32
    %51 = tpu.dynamic_rotate %48 by %c64_i32_22 dim 1 : vector<8x128xf32>, i32 -> vector<8x128xf32>
    %52 = arith.mulf %48, %50 : vector<8x128xf32>
    %53 = math.tanh %52 : vector<8x128xf32>
    %54 = arith.mulf %51, %53 : vector<8x128xf32>
    %55 = arith.truncf %54 : vector<8x128xf32> to vector<8x128xbf16>
    %c0_23 = arith.constant 0 : index
    %c0_24 = arith.constant 0 : index
    %56 = vector.load %arg7[%c0_23, %c0_24] : memref<128x128xbf16, #tpu.memory_space<vmem>>, vector<128x128xbf16>
    %cst_25 = arith.constant dense<0.000000e+00> : vector<8x128xf32>
    %57 = tpu.matmul %55, %56, %cst_25 {dimension_numbers = #tpu.dot_dimension_numbers<[1], [0], [0], [1], [0, 0, 1, 1], [], []>} : vector<8x128xbf16>, vector<128x128xbf16>, vector<8x128xf32> -> vector<8x128xf32>
    %c0_26 = arith.constant 0 : index
    %c0_27 = arith.constant 0 : index
    %58 = vector.load %arg8[%c0_26, %c0_27] : memref<1x128xf32, #tpu.memory_space<vmem>>, vector<1x128xf32>
    %59 = vector.broadcast %58 : vector<1x128xf32> to vector<8x128xf32>
    %60 = arith.addf %57, %59 : vector<8x128xf32>
    %c0_28 = arith.constant 0 : index
    %c0_29 = arith.constant 0 : index
    %61 = vector.load %arg9[%c0_28, %c0_29] : memref<8x128xf32, #tpu.memory_space<vmem>>, vector<8x128xf32>
    tpu.vector_store %arg9[%c0_28, %c0_29], %60 {strides = array<i32>} : memref<8x128xf32, #tpu.memory_space<vmem>>, vector<8x128xf32>,
    return
  }
  func.func @transform_0(%arg0: i32) -> (i32, i32) {
    %c0_i32 = arith.constant 0 : i32
    %c0_i32_0 = arith.constant 0 : i32
    return %arg0, %c0_i32 : i32, i32
  }
  func.func @transform_1(%arg0: i32) -> (i32, i32) {
    %c0_i32 = arith.constant 0 : i32
    %c0_i32_0 = arith.constant 0 : i32
    return %arg0, %c0_i32 : i32, i32
  }
  func.func @transform_2(%arg0: i32) -> (i32, i32) {
    %c0_i32 = arith.constant 0 : i32
    %c0_i32_0 = arith.constant 0 : i32
    %c0_i32_1 = arith.constant 0 : i32
    return %c0_i32, %c0_i32_0 : i32, i32
  }
  func.func @transform_3(%arg0: i32) -> (i32, i32) {
    %c0_i32 = arith.constant 0 : i32
    %c0_i32_0 = arith.constant 0 : i32
    %c0_i32_1 = arith.constant 0 : i32
    return %c0_i32, %c0_i32_0 : i32, i32
  }
  func.func @transform_4(%arg0: i32) -> (i32, i32) {
    %c0_i32 = arith.constant 0 : i32
    %c0_i32_0 = arith.constant 0 : i32
    %c0_i32_1 = arith.constant 0 : i32
    return %c0_i32, %c0_i32_0 : i32, i32
  }
  func.func @transform_5(%arg0: i32) -> (i32, i32) {
    %c0_i32 = arith.constant 0 : i32
    %c0_i32_0 = arith.constant 0 : i32
    %c0_i32_1 = arith.constant 0 : i32
    return %c0_i32, %c0_i32_0 : i32, i32
  }
  func.func @transform_6(%arg0: i32) -> (i32, i32) {
    %c0_i32 = arith.constant 0 : i32
    %c0_i32_0 = arith.constant 0 : i32
    %c0_i32_1 = arith.constant 0 : i32
    return %c0_i32, %c0_i32_0 : i32, i32
  }
  func.func @transform_7(%arg0: i32) -> (i32, i32) {
    %c0_i32 = arith.constant 0 : i32
    %c0_i32_0 = arith.constant 0 : i32
    %c0_i32_1 = arith.constant 0 : i32
    return %c0_i32, %c0_i32_0 : i32, i32
  }
  func.func @transform_8(%arg0: i32) -> (i32, i32) {
    %c0_i32 = arith.constant 0 : i32
    %c0_i32_0 = arith.constant 0 : i32
    return %arg0, %c0_i32 : i32, i32
  }
}

</mosaic_0001>

<bundles_post_ra>
// kernel: _lambda_.1
= control target key start
LH: loop header
LB: loop body
LE: loop exit
PB: predicated region body
PF: predicated region fallthrough
CT: control target
= control target key end

     0   :  { %13 = vsyncpa [#allocation3], 0  ;;  %s872_s0 = inlined_call_operand.vmem [shape: bf16[8,128], index: 0, kind: input, shape index: {}]   ;;  %s873_s1 = inlined_call_operand.vmem [shape: s32[8,2], index: 1, kind: input, shape index: {}]   ;;  %s874_s2 = inlined_call_operand.hbm [shape: bf16[256,128], index: 2, kind: input, shape index: {}]   ;;  %s875_s3 = inlined_call_operand.vmem [shape: f32[1,128], index: 3, kind: input, shape index: {}]   ;;  %s876_s4 = inlined_call_operand.hbm [shape: bf16[128,128], index: 4, kind: input, shape index: {}]   ;;  %s877_s5 = inlined_call_operand.vmem [shape: f32[1,128], index: 5, kind: input, shape index: {}]   ;;  %s878_s6 = inlined_call_operand.vmem [shape: bf16[128,128], index: 6, kind: input, shape index: {}]   ;;  %s879_s7 = inlined_call_operand.vmem [shape: f32[1,128], index: 7, kind: input, shape index: {}]   ;;  %s880_s8 = inlined_call_operand.vmem [shape: f32[8,128], index: 8, kind: output, shape index: {}]  }
   0x1   :  { %14 = vsyncpa [#allocation5], 0  ;;  %s725_s27 = smov [#allocation2]   ;;  %s677_s9 = scalar_lea.hbm %s874_s2, 2048 }
   0x2   :  { %s24_s28 = sshll.u32 %s725_s27, 4  ;;  %p678_p0 = scmp.ne.s32.totalorder %s874_s2, %s677_s9  ;;  %s25_s28 = int_to_ptr.vmem [resolvable:$true] %s24_s28 }
   0x3   :  { %p681_p1 = scmp.lt.u32.totalorder %s677_s9, %s874_s2 }
   0x5   :  { %p683_p2 = pnand %p681_p1, %p678_p0 }
   0x7   :  { %686 = shalt.err (!%p683_p2)
}
   0x8   :  { %s687_s14 = scalar_lea.vmem %s25_s28, 2048  ;;  %p692_p4 = scmp.lt.s32.totalorder %s25_s28, %s25_s28 }
   0x9   :  { %p688_p3 = scmp.ne.s32.totalorder %s25_s28, %s687_s14  ;;  %p693_p5 = scmp.lt.s32.totalorder %s687_s14, %s687_s14 }
   0xb   :  { %p694_p6 = por %p693_p5, %p692_p4 }
   0xd   :  { %p695_p7 = pnand %p694_p6, %p688_p3 }
   0xf   :  { %698 = shalt.err (!%p695_p7)
}
  0x10   :  { %s726_s15 = smov 64   ;;  %s727_s16 = smov 4  }
  0x11   :  { %30 = dma.hbm_to_vmem [thread:$0]  %s874_s2, 2048, %s25_s28, [#allocation3], %s726_s15, %s726_s15, %s727_s16  }
  0x12   :  { %s728_s19 = smov [#allocation4]   ;;  %s699_s23 = scalar_lea.hbm %s876_s4, 1024 }
  0x13   :  { %s38_s20 = sshll.u32 %s728_s19, 4  ;;  %p700_p8 = scmp.ne.s32.totalorder %s876_s4, %s699_s23  ;;  %s39_s20 = int_to_ptr.vmem [resolvable:$true] %s38_s20 }
  0x14   :  { %p703_p9 = scmp.lt.u32.totalorder %s699_s23, %s876_s4 }
  0x16   :  { %p705_p10 = pnand %p703_p9, %p700_p8 }
  0x18   :  { %708 = shalt.err (!%p705_p10)
}
  0x19   :  { %s709_s29 = scalar_lea.vmem %s39_s20, 1024  ;;  %p714_p12 = scmp.lt.s32.totalorder %s39_s20, %s39_s20 }
  0x1a   :  { %p710_p11 = scmp.ne.s32.totalorder %s39_s20, %s709_s29  ;;  %p715_p13 = scmp.lt.s32.totalorder %s709_s29, %s709_s29 }
  0x1c   :  { %p716_p0 = por %p715_p13, %p714_p12 }
  0x1e   :  { %p717_p1 = pnand %p716_p0, %p710_p11 }
  0x20   :  { %720 = shalt.err (!%p717_p1)
}
  0x21   :  { %44 = dma.hbm_to_vmem [thread:$0]  %s876_s4, 1024, %s39_s20, [#allocation5], %s726_s15, %s726_s15, %s727_s16  }
  0x22   :  { %721 = dma.done.wait [#allocation3], 2048  }
  0x23   :  { %722 = vsyncadd [#allocation3], 4294965248 }
  0x24   :  { %723 = dma.done.wait [#allocation5], 1024  }
  0x25   :  { %724 = vsyncadd [#allocation5], 4294966272  ;;  %v729_v0 = vmov 0   ;;  %v61_v1 = vld [vmem:[%s873_s1] sm:$0xff]  ;;  %v635_v5 = vld [vmem:[#allocation2 + $0x48] sm:$0xff]   ;;  %v730_v7 = vmov 1   ;;  %v59_v20 = vlaneseq }
  0x26   :  { %631 = vset.pattern.permute.xlu0 %v729_v0  ;;  %v633_v2 = vld [vmem:[#allocation2 + $0x40] sm:$0xff]   ;;  %v66_v3 = vadd.s32 10, %v61_v1  ;;  %v636_v6 = vld [vmem:[#allocation2 + $0x8] sm:$0xff]   ;;  %v637_v8 = vld [vmem:[#allocation2 + $0x50] sm:$0xff]   ;;  %v731_v25 = vmov 1.0|1.0  }
  0x27   :  { %63 = vperm.xlu0 %631, %v61_v1   ;;  %v634_v4 = vld [vmem:[#allocation2] sm:$0xff]   ;;  %541 = vmatprep.subr.bf16.mxu0 %v633_v2  ;;  %v638_v9 = vld [vmem:[#allocation2 + $0x10] sm:$0xff]   ;;  %v639_v10 = vld [vmem:[#allocation2 + $0x58] sm:$0xff]   ;;  %v60_v22 = vand.u32 127, %v59_v20  ;;  %v732_v27 = vmov 0.0   ;;  %vm734_vm4 = vmmov 0  }
  0x28   :  { %542 = vmatpush3.bf16.msra.mxu0 %v634_v4  ;;  %v640_v11 = vld [vmem:[#allocation2 + $0x18] sm:$0xff]   ;;  %v641_v12 = vld [vmem:[#allocation2 + $0x60] sm:$0xff]   ;;  %v643_v14 = vld [vmem:[#allocation2 + $0x68] sm:$0xff]   ;;  %581 = vmatprep.subr.bf16.mxu1 %v732_v27 }
  0x29   :  { %543 = vmatprep.subr.bf16.mxu0 %v635_v5  ;;  %v642_v13 = vld [vmem:[#allocation2 + $0x20] sm:$0xff]   ;;  %v644_v15 = vld [vmem:[#allocation2 + $0x28] sm:$0xff]   ;;  %v645_v16 = vld [vmem:[#allocation2 + $0x70] sm:$0xff]   ;;  %597 = vmatprep.mubr.msk.bf16.mxu1 %vm734_vm4, %v732_v27 }
  0x2a   :  { %v646_v17 = vld [vmem:[#allocation2 + $0x30] sm:$0xff]   ;;  %v647_v18 = vld [vmem:[#allocation2 + $0x78] sm:$0xff]   ;;  %v58_v24 = vld [vmem:[%s872_s0] sm:$0xf] }
  0x2b   :  { %632 = vset.pattern.permute.xlu0 %v730_v7  ;;  %v648_v19 = vld [vmem:[#allocation2 + $0x38] sm:$0xff]   ;;  %v649_v26 = vld [vmem:[#allocation4] sm:$0xff]   ;;  %v650_v28 = vld [vmem:[#allocation4 + $0x8] sm:$0xff]  }
  0x2c   :  { %68 = vperm.xlu0 %632, %v66_v3   ;;  %544 = vmatpush3.bf16.msra.mxu0 %v636_v6  ;;  %v651_v29 = vld [vmem:[#allocation4 + $0x10] sm:$0xff]   ;;  %v652_v30 = vld [vmem:[#allocation4 + $0x18] sm:$0xff]   ;;  %v504_v32 = vld [vmem:[%s875_s3] ss:$0 sm:$0xff]  ;;  %s733_s3 = smov 96  }
  0x2d   :  { %545 = vmatprep.subr.bf16.mxu0 %v637_v8  ;;  %582 = vmatpush3.bf16.msra.mxu1 %v649_v26  ;;  %v653_v38 = vld [vmem:[#allocation4 + $0x20] sm:$0xff]   ;;  %v654_v40 = vld [vmem:[#allocation4 + $0x28] sm:$0xff]   ;;  %v655_v41 = vld [vmem:[#allocation4 + $0x30] sm:$0xff]  }
  0x2e   :  { %583 = vmatprep.subr.bf16.mxu1 %v732_v27  ;;  %v656_v43 = vld [vmem:[#allocation4 + $0x38] sm:$0xff]   ;;  %v657_v53 = vld [vmem:[%s878_s6] sm:$0xff]   ;;  %v658_v54 = vld [vmem:[%s878_s6 + $0x8] sm:$0xff]  }
  0x2f   :  { %v659_v55 = vld [vmem:[%s878_s6 + $0x10] sm:$0xff]   ;;  %v660_v56 = vld [vmem:[%s878_s6 + $0x18] sm:$0xff]   ;;  %v523_v57 = vld [vmem:[%s877_s5] ss:$0 sm:$0xff] }
  0x30   :  { %546 = vmatpush3.bf16.msra.mxu0 %v638_v9  ;;  %v661_v61 = vld [vmem:[%s878_s6 + $0x20] sm:$0xff]   ;;  %v662_v1 = vld [vmem:[%s878_s6 + $0x28] sm:$0xff]   ;;  %v663_v2 = vld [vmem:[%s878_s6 + $0x30] sm:$0xff]  }
  0x31   :  { %547 = vmatprep.subr.bf16.mxu0 %v639_v10  ;;  %584 = vmatpush3.bf16.msra.mxu1 %v650_v28  ;;  %v664_v4 = vld [vmem:[%s878_s6 + $0x38] sm:$0xff]  }
  0x32   :  { %585 = vmatprep.subr.bf16.mxu1 %v732_v27 }
  0x34   :  { %548 = vmatpush3.bf16.msra.mxu0 %v640_v11 }
  0x35   :  { %549 = vmatprep.subr.bf16.mxu0 %v641_v12  ;;  %586 = vmatpush3.bf16.msra.mxu1 %v651_v29 }
  0x36   :  { %587 = vmatprep.subr.bf16.mxu1 %v732_v27 }
  0x38   :  { %550 = vmatpush3.bf16.msra.mxu0 %v642_v13 }
  0x39   :  { %551 = vmatprep.subr.bf16.mxu0 %v643_v14  ;;  %588 = vmatpush3.bf16.msra.mxu1 %v652_v30  ;;  %v532_v14 = vld [vmem:[%s879_s7] ss:$0 sm:$0xff] }
  0x3a   :  { %589 = vmatprep.subr.bf16.mxu1 %v732_v27 }
  0x3c   :  { %552 = vmatpush3.bf16.msra.mxu0 %v644_v15 }
  0x3d   :  { %553 = vmatprep.subr.bf16.mxu0 %v645_v16  ;;  %590 = vmatpush3.bf16.msra.mxu1 %v653_v38 }
  0x3e   :  { %591 = vmatprep.subr.bf16.mxu1 %v732_v27 }
  0x40   :  { %554 = vmatpush3.bf16.msra.mxu0 %v646_v17 }
  0x41   :  { %555 = vmatprep.subr.bf16.mxu0 %v647_v18  ;;  %592 = vmatpush3.bf16.msra.mxu1 %v654_v40 }
  0x42   :  { %593 = vmatprep.subr.bf16.mxu1 %v732_v27 }
  0x44   :  { %556 = vmatpush3.bf16.msra.mxu0 %v648_v19 }
  0x45   :  { %601 = vmatprep.subr.bf16.mxu0 %v732_v27  ;;  %594 = vmatpush3.bf16.msra.mxu1 %v655_v41 }
  0x46   :  { %595 = vmatprep.subr.bf16.mxu1 %v732_v27 }
  0x49   :  { %596 = vmatpush3.bf16.msra.mxu1 %v656_v43 }
  0xa6   :  { %v64_v21 = vpop.permute.xlu0 %63 }
  0xa7   :  { %vm65_vm0 = vcmp.eq.s32.totalorder %v60_v22, %v64_v21 }
  0xab   :  { %v69_v23 = vpop.permute.xlu0 %68 }
  0xac   :  { %vm70_vm1 = vcmp.eq.s32.totalorder %v60_v22, %v69_v23 }
  0xad   :  { %vm71_vm2 = vmor %vm65_vm0, %vm70_vm1 }
  0xae   :  { %vm521_vm3 = vmpackc.low %vm71_vm2, %vm71_vm2 }
  0xaf   :  { %522 = vmatprep.mubr.msk.bf16.mxu0 %vm521_vm3, %v731_v25 }
  0xb0   :  { %242 = vmatmul.mubr.bf16.vlgmr.msra.gmra.mrb[0].mxu0 %v58_v24 }
  0xb1   :  { %617 = vmatprep.mubr.msk.bf16.mxu0 %vm734_vm4, %v732_v27  ;;  %602 = vmatpush3.bf16.msra.mxu0 %v657_v53 }
  0xb2   :  { %603 = vmatprep.subr.bf16.mxu0 %v732_v27 }
  0xb5   :  { %604 = vmatpush3.bf16.msra.mxu0 %v658_v54 }
  0xb6   :  { %605 = vmatprep.subr.bf16.mxu0 %v732_v27 }
  0xb9   :  { %606 = vmatpush3.bf16.msra.mxu0 %v659_v55 }
  0xba   :  { %607 = vmatprep.subr.bf16.mxu0 %v732_v27 }
  0xbd   :  { %608 = vmatpush3.bf16.msra.mxu0 %v660_v56 }
  0xbe   :  { %609 = vmatprep.subr.bf16.mxu0 %v732_v27 }
  0xc1   :  { %610 = vmatpush3.bf16.msra.mxu0 %v661_v61 }
  0xc2   :  { %611 = vmatprep.subr.bf16.mxu0 %v732_v27 }
  0xc5   :  { %612 = vmatpush3.bf16.msra.mxu0 %v662_v1 }
  0xc6   :  { %613 = vmatprep.subr.bf16.mxu0 %v732_v27 }
  0xc9   :  { %614 = vmatpush3.bf16.msra.mxu0 %v663_v2 }
  0xca   :  { %615 = vmatprep.subr.bf16.mxu0 %v732_v27 }
  0xcd   :  { %616 = vmatpush3.bf16.msra.mxu0 %v664_v4 }
 0x183   :  { %v557_v31 = vpop.f32.mrb[0].mxu0 }
 0x184   :  { %v558_v33 = vpop.f32.mrb[1].mxu0 }
 0x185   :  { %v559_v34 = vadd.f32 %v558_v33, %v557_v31  ;;  %v560_v35 = vpop.f32.mrb[2].mxu0 }
 0x186   :  { %v561_v36 = vpop.f32.mrb[3].mxu0 }
 0x187   :  { %v244_v37 = vadd.f32 %v559_v34, %v504_v32 }
 0x189   :  { %v249_v39 = vmul.f32 0.5, %v244_v37  ;;  %665 = vtanh.f32 %v244_v37 }
 0x18b   :  { %667 = vtanh.f32 %v249_v39 }
 0x193   :  { %v666_v42 = vpop.eup %665 }
 0x194   :  { %254 = vrot.lane.b32.xlu1 %v666_v42, %s733_s3 }
 0x195   :  { %v668_v44 = vpop.eup %667 }
 0x196   :  { %v251_v45 = vmul.f32 0.5, %v668_v44 }
 0x198   :  { %v252_v46 = vadd.f32 0.5, %v251_v45 }
 0x19a   :  { %256 = vrot.lane.b32.xlu1 %v252_v46, %s726_s15 }
 0x206   :  { %v255_v47 = vpop.permute.xlu1 %254 }
 0x207   :  { %v258_v48 = vmul.f32 %v255_v47, %v252_v46 }
 0x209   :  { %669 = vtanh.f32 %v258_v48 }
 0x20c   :  { %v257_v50 = vpop.permute.xlu1 %256 }
 0x213   :  { %v670_v49 = vpop.eup %669 }
 0x214   :  { %v260_v51 = vmul.f32 %v670_v49, %v257_v50 }
 0x216   :  { %v261_v52 = vpack.c.bf16 %v260_v51, %v260_v51 }
 0x218   :  { %598 = vmatmul.mubr.bf16.vlgmr.msra.gmra.mrb[0].mxu1 %v261_v52 }
 0x2eb   :  { %v367_v58 = vpop.f32.mrb[0].mxu1 }
 0x2ec   :  { %v368_v59 = vadd.f32 %v523_v57, %v367_v58  ;;  %v599_v60 = vpop.f32.mrb[1].mxu1 }
 0x2ed   :  { %v370_v62 = vpop.f32.mrb[2].mxu1 }
 0x2ee   :  { %v373_v63 = vmul.f32 0.5, %v368_v59  ;;  %671 = vtanh.f32 %v368_v59  ;;  %v600_v0 = vpop.f32.mrb[3].mxu1 }
 0x2f0   :  { %673 = vtanh.f32 %v373_v63 }
 0x2f8   :  { %v672_v3 = vpop.eup %671 }
 0x2f9   :  { %378 = vrot.lane.b32.xlu1 %v672_v3, %s733_s3 }
 0x2fa   :  { %v674_v5 = vpop.eup %673 }
 0x2fb   :  { %v375_v6 = vmul.f32 0.5, %v674_v5 }
 0x2fd   :  { %v376_v7 = vadd.f32 0.5, %v375_v6 }
 0x2ff   :  { %380 = vrot.lane.b32.xlu0 %v376_v7, %s726_s15 }
 0x36b   :  { %v379_v8 = vpop.permute.xlu1 %378 }
 0x36c   :  { %v382_v9 = vmul.f32 %v379_v8, %v376_v7 }
 0x36e   :  { %675 = vtanh.f32 %v382_v9 }
 0x371   :  { %v381_v11 = vpop.permute.xlu0 %380 }
 0x378   :  { %v676_v10 = vpop.eup %675 }
 0x379   :  { %v384_v12 = vmul.f32 %v676_v10, %v381_v11 }
 0x37b   :  { %v385_v13 = vpack.c.bf16 %v384_v12, %v384_v12 }
 0x37d   :  { %618 = vmatmul.mubr.bf16.vlgmr.msra.gmra.mrb[4].mxu0 %v385_v13 }
 0x450   :  { %v491_v15 = vpop.f32.mrb[4].mxu0 }
 0x451   :  { %v492_v16 = vadd.f32 %v532_v14, %v491_v15  ;;  %v619_v17 = vpop.f32.mrb[5].mxu0 }
 0x452   :  { %v494_v18 = vpop.f32.mrb[6].mxu0 }
 0x453   :  { %497 = vst [vmem:[%s880_s8] sm:$0xff] %v492_v16  ;;  %v620_v19 = vpop.f32.mrb[7].mxu0 }
 0x454   :  { %502 = vsyncpa [#allocation3], 1 }
 0x455   :  { %503 = vsyncpa [#allocation5], 1 }

</bundles_post_ra>
